<compile_context>
chip_gen: v5e
topology: v5e:2x2
jax: 0.10.0
libtpu: 0.0.40
codegen_flags: <defaults>
</compile_context>

<pallas_src>
import jax
import jax.numpy as jnp
from jax.experimental import pallas as pl
from jax.experimental.pallas import tpu as pltpu

HIDDEN = 256
OUT_DIM = 2
LANE = 128  # TPU lane width; output columns padded up to this for lane-dense stores


def _round_up(x, m):
    return (x + m - 1) // m * m


def _cdiv(a, b):
    return (a + b - 1) // b


def valuenet_kernel(x_ref, w1_ref, b1_ref, w2_ref, b2_ref, w3_ref, b3_ref, o_ref):
    cdt = w1_ref.dtype  # MXU operand dtype (bf16 or f32); accumulation is always f32
    # Layer 1: (tb, state_dim) @ (state_dim, 256); short K handled by Mosaic.
    h = jnp.dot(x_ref[...], w1_ref[...], preferred_element_type=jnp.float32)
    h = jnp.maximum(h + b1_ref[...], 0.0)
    # Layer 2: (tb, 256) @ (256, 256)
    h = jnp.dot(h.astype(cdt), w2_ref[...], preferred_element_type=jnp.float32)
    h = jnp.maximum(h + b2_ref[...], 0.0)
    # Layer 3: (tb, 256) @ (256, 128) -- padded output columns are exact zeros
    o = jnp.dot(h.astype(cdt), w3_ref[...], preferred_element_type=jnp.float32)
    o_ref[...] = (o + b3_ref[...]).astype(o_ref.dtype)


def init_value_net_params(key, state_dim, edge=0.003):
    """Logical (unpadded) params mirroring nn.Linear defaults + the uniform(-edge, edge)
    override on linear3. Weights are stored (in, out) (transposed vs PyTorch)."""
    k1, k2, k3, k4, k5, k6 = jax.random.split(key, 6)

    def uniform(k, shape, bound):
        return jax.random.uniform(k, shape, jnp.float32, -bound, bound)

    bnd1 = 1.0 / jnp.sqrt(state_dim)
    bnd2 = 1.0 / jnp.sqrt(HIDDEN)

    w1 = uniform(k1, (state_dim, HIDDEN), bnd1)
    b1 = uniform(k2, (1, HIDDEN), bnd1)
    w2 = uniform(k3, (HIDDEN, HIDDEN), bnd2)
    b2 = uniform(k4, (1, HIDDEN), bnd2)
    w3 = uniform(k5, (HIDDEN, OUT_DIM), edge)
    b3 = uniform(k6, (1, OUT_DIM), edge)
    return (w1, b1, w2, b2, w3, b3)


def prepare_params(params, compute_dtype=jnp.bfloat16):
    """Prepare kernel params.

    - W1 stays (state_dim, 256) UNPADDED (no lane padding of the tiny K dim).
    - W3/b3 zero-padded 2 -> 128 output columns (lane-dense stores; padded cols = 0).
    - Weight operands cast to compute_dtype (default bf16: MXU-native on v5e/v6e/v7x,
      halves weight + activation DMA). Note the in-kernel inter-layer activations are
      also rounded to compute_dtype before each matmul; biases/accumulator stay f32.
    """
    w1, b1, w2, b2, w3, b3 = params
    w3p = jnp.zeros((HIDDEN, LANE), jnp.float32).at[:, :OUT_DIM].set(w3)
    b3p = jnp.zeros((1, LANE), jnp.float32).at[:, :OUT_DIM].set(b3)
    return (
        w1.astype(compute_dtype),
        b1.astype(jnp.float32),
        w2.astype(compute_dtype),
        b2.astype(jnp.float32),
        w3p.astype(compute_dtype),
        b3p,  # f32, zero in padded columns
    )


def value_net_forward(state, padded_params, *, max_tb=512, core_parallel=False):
    """Fused MLP forward. state: (B, state_dim) f32. Returns (B, 2) f32.

    core_parallel=True (only meaningful on v7x with >= 2 grid steps) shards the
    batch-tile axis across the two TensorCores via pltpu.CORE_PARALLEL.
    """
    w1, b1, w2, b2, w3, b3 = padded_params
    B, state_dim = state.shape
    assert w1.shape == (state_dim, HIDDEN)
    compute_dtype = w1.dtype
    # bf16 operands -> bf16 padded output slab (halves writeback); cast back after slice.
    out_dtype = jnp.bfloat16 if compute_dtype == jnp.bfloat16 else jnp.float32

    # --- batch tile selection: single grid step whenever possible ---
    sub = 16 if compute_dtype == jnp.bfloat16 else 8  # sublane packing granule
    b_min = _round_up(B, sub)
    if b_min <= max_tb:
        tb = b_min                        # grid = (1,), zero padding waste
    else:
        steps = _cdiv(b_min, max_tb)      # spread rows evenly; waste < steps*sub rows
        tb = _round_up(_cdiv(b_min, steps), sub)
    b_pad = _round_up(B, tb)
    grid = (b_pad // tb,)

    # Unpadded-K input: no HBM-materialized 128-lane slab. Pad only the few trailing
    # batch rows needed so b_pad is a whole number of tiles.
    x = state.astype(compute_dtype)
    if b_pad != B:
        x = jnp.zeros((b_pad, state_dim), compute_dtype).at[:B, :].set(x)

    in_specs = [
        pl.BlockSpec((tb, state_dim), lambda i: (i, 0)),      # x tile (K unpadded)
        pl.BlockSpec((state_dim, HIDDEN), lambda i: (0, 0)),  # W1 (VMEM-resident)
        pl.BlockSpec((1, HIDDEN), lambda i: (0, 0)),          # b1
        pl.BlockSpec((HIDDEN, HIDDEN), lambda i: (0, 0)),     # W2 (resident)
        pl.BlockSpec((1, HIDDEN), lambda i: (0, 0)),          # b2
        pl.BlockSpec((HIDDEN, LANE), lambda i: (0, 0)),       # W3 padded (resident)
        pl.BlockSpec((1, LANE), lambda i: (0, 0)),            # b3 padded
    ]
    out_specs = pl.BlockSpec((tb, LANE), lambda i: (i, 0))    # lane-dense stores

    # Advisory cost hint for XLA scheduling around this small custom call.
    cbytes = jnp.dtype(compute_dtype).itemsize
    flops = 2 * B * (state_dim * HIDDEN + HIDDEN * HIDDEN + HIDDEN * OUT_DIM)
    bytes_accessed = (
        b_pad * state_dim * cbytes                                      # x
        + (state_dim * HIDDEN + HIDDEN * HIDDEN + HIDDEN * LANE) * cbytes  # weights
        + (2 * HIDDEN + LANE) * 4                                       # biases (f32)
        + b_pad * LANE * jnp.dtype(out_dtype).itemsize                  # output slab
    )

    if core_parallel and grid[0] >= 2:
        dim_sem = (pltpu.CORE_PARALLEL,)   # v7x: split batch tiles across both TCs
    else:
        # "parallel" vs "arbitrary" is a wash and does not by itself split across
        # v7x TensorCores; kept for documentation of independence across tiles.
        dim_sem = ("parallel",)

    out = pl.pallas_call(
        valuenet_kernel,
        out_shape=jax.ShapeDtypeStruct((b_pad, LANE), out_dtype),
        grid_spec=pltpu.PrefetchScalarGridSpec(
            num_scalar_prefetch=0,
            grid=grid,
            in_specs=in_specs,
            out_specs=out_specs,
        ),
        compiler_params=pltpu.CompilerParams(dimension_semantics=dim_sem),
        cost_estimate=pl.CostEstimate(
            flops=flops, transcendentals=0, bytes_accessed=bytes_accessed
        ),
    )(x, w1, b1, w2, b2, w3, b3)

    # Slice off batch padding and the 126 zero output columns; return f32.
    return out[:B, :OUT_DIM].astype(jnp.float32)


def value_net_ref(state, params):
    """Pure-JAX reference of the PyTorch forward (unpadded logical params)."""
    w1, b1, w2, b2, w3, b3 = params
    x = jnp.maximum(state @ w1 + b1, 0.0)
    x = jnp.maximum(x @ w2 + b2, 0.0)
    return x @ w3 + b3


if __name__ == "__main__":
    key = jax.random.PRNGKey(0)
    kp, kx, kx2 = jax.random.split(key, 3)

    batch, state_dim = 16, 16  # small SAC-sized state
    params = init_value_net_params(kp, state_dim)
    state = jax.random.normal(kx, (batch, state_dim), jnp.float32)
    ref = value_net_ref(state, params)

    # --- f32 operand path (exact wrt the reference) ---
    pp_f32 = prepare_params(params, jnp.float32)
    out = jax.block_until_ready(value_net_forward(state, pp_f32))
    assert out.shape == (batch, OUT_DIM)
    assert jnp.allclose(out, ref, atol=1e-5, rtol=1e-5), "f32 mismatch vs reference"

    # --- default bf16 operand path (bf16 rounding of weights AND activations) ---
    pp_bf16 = prepare_params(params)
    out_bf16 = jax.block_until_ready(value_net_forward(state, pp_bf16))
    assert out_bf16.shape == (batch, OUT_DIM)
    assert jnp.allclose(out_bf16, ref, atol=2e-2, rtol=2e-2), "bf16 mismatch"

    # --- ragged batch + forced multi-step grid (exercises tiling & row padding) ---
    state_big = jax.random.normal(kx2, (260, state_dim), jnp.float32)
    ref_big = value_net_ref(state_big, params)
    out_big = jax.block_until_ready(value_net_forward(state_big, pp_f32, max_tb=128))
    assert out_big.shape == (260, OUT_DIM)
    assert jnp.allclose(out_big, ref_big, atol=1e-5, rtol=1e-5), "tiled mismatch"

    print("KERNEL_OK")
</pallas_src>

<mosaic_0001>
module attributes {stable_mosaic.version = 11 : i64} {
  func.func @valuenet_kernel(%arg0: i32, %arg1: memref<16x16xf32, #tpu.memory_space<vmem>>, %arg2: memref<16x256xf32, #tpu.memory_space<vmem>>, %arg3: memref<1x256xf32, #tpu.memory_space<vmem>>, %arg4: memref<256x256xf32, #tpu.memory_space<vmem>>, %arg5: memref<1x256xf32, #tpu.memory_space<vmem>>, %arg6: memref<256x128xf32, #tpu.memory_space<vmem>>, %arg7: memref<1x128xf32, #tpu.memory_space<vmem>>, %arg8: memref<16x128xf32, #tpu.memory_space<vmem>>) attributes {dimension_semantics = [#tpu.dimension_semantics<parallel>], iteration_bounds = array<i64: 1>, scalar_prefetch = 0 : i64, scratch_operands = 0 : i64, tpu.core_type = #tpu.core_type<tc>, window_params = [{transform_indices = @transform_0, window_bounds = array<i64: 16, 16>}, {pipeline_mode = #tpu.pipeline_mode<synchronous>, transform_indices = @transform_1, window_bounds = array<i64: 16, 256>}, {pipeline_mode = #tpu.pipeline_mode<synchronous>, transform_indices = @transform_2, window_bounds = array<i64: 1, 256>}, {pipeline_mode = #tpu.pipeline_mode<synchronous>, transform_indices = @transform_3, window_bounds = array<i64: 256, 256>}, {pipeline_mode = #tpu.pipeline_mode<synchronous>, transform_indices = @transform_4, window_bounds = array<i64: 1, 256>}, {pipeline_mode = #tpu.pipeline_mode<synchronous>, transform_indices = @transform_5, window_bounds = array<i64: 256, 128>}, {pipeline_mode = #tpu.pipeline_mode<synchronous>, transform_indices = @transform_6, window_bounds = array<i64: 1, 128>}, {transform_indices = @transform_7, window_bounds = array<i64: 16, 128>}]} {
    %c0 = arith.constant 0 : index
    %c0_0 = arith.constant 0 : index
    %0 = vector.load %arg1[%c0, %c0_0] : memref<16x16xf32, #tpu.memory_space<vmem>>, vector<16x16xf32>
    %c0_1 = arith.constant 0 : index
    %c0_2 = arith.constant 0 : index
    %1 = vector.load %arg2[%c0_1, %c0_2] : memref<16x256xf32, #tpu.memory_space<vmem>>, vector<16x256xf32>
    %cst = arith.constant dense<0.000000e+00> : vector<16x256xf32>
    %2 = tpu.matmul %0, %1, %cst {dimension_numbers = #tpu.dot_dimension_numbers<[1], [0], [0], [1], [0, 0, 1, 1], [], []>} : vector<16x16xf32>, vector<16x256xf32>, vector<16x256xf32> -> vector<16x256xf32>
    %c0_3 = arith.constant 0 : index
    %c0_4 = arith.constant 0 : index
    %3 = vector.load %arg3[%c0_3, %c0_4] : memref<1x256xf32, #tpu.memory_space<vmem>>, vector<1x256xf32>
    %4 = vector.broadcast %3 : vector<1x256xf32> to vector<16x256xf32>
    %5 = arith.addf %2, %4 : vector<16x256xf32>
    %cst_5 = arith.constant 0.000000e+00 : f32
    %6 = vector.broadcast %cst_5 : f32 to vector<16x256xf32>
    %7 = arith.maximumf %5, %6 : vector<16x256xf32>
    %c0_6 = arith.constant 0 : index
    %c0_7 = arith.constant 0 : index
    %8 = vector.load %arg4[%c0_6, %c0_7] : memref<256x256xf32, #tpu.memory_space<vmem>>, vector<256x256xf32>
    %cst_8 = arith.constant dense<0.000000e+00> : vector<16x256xf32>
    %9 = tpu.matmul %7, %8, %cst_8 {dimension_numbers = #tpu.dot_dimension_numbers<[1], [0], [0], [1], [0, 0, 1, 1], [], []>} : vector<16x256xf32>, vector<256x256xf32>, vector<16x256xf32> -> vector<16x256xf32>
    %c0_9 = arith.constant 0 : index
    %c0_10 = arith.constant 0 : index
    %10 = vector.load %arg5[%c0_9, %c0_10] : memref<1x256xf32, #tpu.memory_space<vmem>>, vector<1x256xf32>
    %11 = vector.broadcast %10 : vector<1x256xf32> to vector<16x256xf32>
    %12 = arith.addf %9, %11 : vector<16x256xf32>
    %cst_11 = arith.constant 0.000000e+00 : f32
    %13 = vector.broadcast %cst_11 : f32 to vector<16x256xf32>
    %14 = arith.maximumf %12, %13 : vector<16x256xf32>
    %c0_12 = arith.constant 0 : index
    %c0_13 = arith.constant 0 : index
    %15 = vector.load %arg6[%c0_12, %c0_13] : memref<256x128xf32, #tpu.memory_space<vmem>>, vector<256x128xf32>
    %cst_14 = arith.constant dense<0.000000e+00> : vector<16x128xf32>
    %16 = tpu.matmul %14, %15, %cst_14 {dimension_numbers = #tpu.dot_dimension_numbers<[1], [0], [0], [1], [0, 0, 1, 1], [], []>} : vector<16x256xf32>, vector<256x128xf32>, vector<16x128xf32> -> vector<16x128xf32>
    %c0_15 = arith.constant 0 : index
    %c0_16 = arith.constant 0 : index
    %17 = vector.load %arg7[%c0_15, %c0_16] : memref<1x128xf32, #tpu.memory_space<vmem>>, vector<1x128xf32>
    %18 = vector.broadcast %17 : vector<1x128xf32> to vector<16x128xf32>
    %19 = arith.addf %16, %18 : vector<16x128xf32>
    %c0_17 = arith.constant 0 : index
    %c0_18 = arith.constant 0 : index
    %20 = vector.load %arg8[%c0_17, %c0_18] : memref<16x128xf32, #tpu.memory_space<vmem>>, vector<16x128xf32>
    tpu.vector_store %arg8[%c0_17, %c0_18], %19 {strides = array<i32>} : memref<16x128xf32, #tpu.memory_space<vmem>>, vector<16x128xf32>,
    return
  }
  func.func @transform_0(%arg0: i32) -> (i32, i32) {
    %c0_i32 = arith.constant 0 : i32
    %c0_i32_0 = arith.constant 0 : i32
    return %arg0, %c0_i32 : i32, i32
  }
  func.func @transform_1(%arg0: i32) -> (i32, i32) {
    %c0_i32 = arith.constant 0 : i32
    %c0_i32_0 = arith.constant 0 : i32
    %c0_i32_1 = arith.constant 0 : i32
    return %c0_i32, %c0_i32_0 : i32, i32
  }
  func.func @transform_2(%arg0: i32) -> (i32, i32) {
    %c0_i32 = arith.constant 0 : i32
    %c0_i32_0 = arith.constant 0 : i32
    %c0_i32_1 = arith.constant 0 : i32
    return %c0_i32, %c0_i32_0 : i32, i32
  }
  func.func @transform_3(%arg0: i32) -> (i32, i32) {
    %c0_i32 = arith.constant 0 : i32
    %c0_i32_0 = arith.constant 0 : i32
    %c0_i32_1 = arith.constant 0 : i32
    return %c0_i32, %c0_i32_0 : i32, i32
  }
  func.func @transform_4(%arg0: i32) -> (i32, i32) {
    %c0_i32 = arith.constant 0 : i32
    %c0_i32_0 = arith.constant 0 : i32
    %c0_i32_1 = arith.constant 0 : i32
    return %c0_i32, %c0_i32_0 : i32, i32
  }
  func.func @transform_5(%arg0: i32) -> (i32, i32) {
    %c0_i32 = arith.constant 0 : i32
    %c0_i32_0 = arith.constant 0 : i32
    %c0_i32_1 = arith.constant 0 : i32
    return %c0_i32, %c0_i32_0 : i32, i32
  }
  func.func @transform_6(%arg0: i32) -> (i32, i32) {
    %c0_i32 = arith.constant 0 : i32
    %c0_i32_0 = arith.constant 0 : i32
    %c0_i32_1 = arith.constant 0 : i32
    return %c0_i32, %c0_i32_0 : i32, i32
  }
  func.func @transform_7(%arg0: i32) -> (i32, i32) {
    %c0_i32 = arith.constant 0 : i32
    %c0_i32_0 = arith.constant 0 : i32
    return %arg0, %c0_i32 : i32, i32
  }
}

</mosaic_0001>

<bundles_post_ra>
// kernel: tpu_custom_call.1
= control target key start
LH: loop header
LB: loop body
LE: loop exit
PB: predicated region body
PF: predicated region fallthrough
CT: control target
= control target key end

     0   :  { %12 = vsyncpa [#allocation3], 0  ;;  %s729_s0 = inlined_call_operand.hbm [shape: f32[16,16], index: 0, kind: input, shape index: {}]   ;;  %s730_s1 = inlined_call_operand.hbm [shape: f32[16,256], index: 1, kind: input, shape index: {}]   ;;  %s731_s2 = inlined_call_operand.hbm [shape: f32[1,256], index: 2, kind: input, shape index: {}]   ;;  %s732_s3 = inlined_call_operand.hbm [shape: f32[256,256], index: 3, kind: input, shape index: {}]   ;;  %s733_s4 = inlined_call_operand.vmem [shape: f32[1,256], index: 4, kind: input, shape index: {}]   ;;  %s734_s5 = inlined_call_operand.hbm [shape: f32[256,128], index: 5, kind: input, shape index: {}]   ;;  %s735_s6 = inlined_call_operand.vmem [shape: f32[1,128], index: 6, kind: input, shape index: {}]   ;;  %s736_s7 = inlined_call_operand.hbm [shape: f32[16,128], index: 7, kind: output, shape index: {}]  }
   0x1   :  { %13 = vsyncpa [#allocation6], 0 }
   0x2   :  { %14 = vsyncpa [#allocation9], 0  ;;  %s33_s26 = sshll.u32 %s730_s1, 4  ;;  %s34_s26 = int_to_ptr.hbm [resolvable:$true] %s33_s26 }
   0x3   :  { %15 = vsyncpa [#allocation4], 0  ;;  %s642_s27 = smov [#allocation5]   ;;  %s57_s8 = sshll.u32 %s732_s3, 4  ;;  %s58_s8 = int_to_ptr.hbm [resolvable:$true] %s57_s8 }
   0x4   :  { %s35_s28 = sshll.u32 %s642_s27, 4  ;;  %s643_s9 = smov 256   ;;  %s36_s28 = int_to_ptr.vmem [resolvable:$true] %s35_s28 }
   0x5   :  { %s644_s10 = smov 16   ;;  %s645_s11 = smov [#allocation8]  }
   0x6   :  { %41 = dma.hbm_to_vmem [thread:$0]  %s34_s26, 512, %s36_s28, [#allocation6], %s643_s9, %s643_s9, %s644_s10  }
   0x7   :  { %s59_s12 = sshll.u32 %s645_s11, 4  ;;  %s20_s15 = sshll.u32 %s729_s0, 4  ;;  %s60_s12 = int_to_ptr.vmem [resolvable:$true] %s59_s12  ;;  %s21_s15 = int_to_ptr.hbm [resolvable:$true] %s20_s15 }
   0x8   :  { %65 = dma.hbm_to_vmem [thread:$0]  %s58_s8, 8192, %s60_s12, [#allocation9], %s643_s9, %s643_s9, %s644_s10  }
   0x9   :  { %s646_s1 = smov [#allocation2]   ;;  %s47_s3 = sshll.u32 %s731_s2, 4  ;;  %s48_s3 = int_to_ptr.hbm [resolvable:$true] %s47_s3 }
   0xa   :  { %s22_s16 = sshll.u32 %s646_s1, 4  ;;  %s647_s19 = smov 128   ;;  %s23_s16 = int_to_ptr.vmem [resolvable:$true] %s22_s16 }
   0xb   :  { %s648_s20 = smov 8   ;;  %s649_s21 = smov [#allocation7]  }
   0xc   :  { %28 = dma.hbm_to_vmem [thread:$0]  %s21_s15, 256, %s23_s16, [#allocation3], %s647_s19, %s647_s19, %s648_s20  }
   0xd   :  { %s49_s22 = sshll.u32 %s649_s21, 4  ;;  %s72_s24 = sshll.u32 %s734_s5, 4  ;;  %s50_s22 = int_to_ptr.vmem [resolvable:$true] %s49_s22  ;;  %s73_s24 = int_to_ptr.hbm [resolvable:$true] %s72_s24 }
   0xe   :  { %52 = dma.hbm_to_vmem [thread:$0]  %s48_s3, 32, %s50_s22, [#allocation6]  }
   0xf   :  { %s650_s25 = smov [#allocation10]  }
  0x10   :  { %s74_s26 = sshll.u32 %s650_s25, 4  ;;  %s75_s26 = int_to_ptr.vmem [resolvable:$true] %s74_s26 }
  0x11   :  { %80 = dma.hbm_to_vmem [thread:$0]  %s73_s24, 4096, %s75_s26, [#allocation9], %s647_s19, %s647_s19, %s648_s20  }
  0x12   :  { %634 = dma.done.wait [#allocation3], 256  }
  0x13   :  { %635 = vsyncadd [#allocation3], 4294967040 }
  0x14   :  { %636 = dma.done.wait [#allocation6], 544  }
  0x15   :  { %637 = vsyncadd [#allocation6], 4294966752 }
  0x16   :  { %638 = dma.done.wait [#allocation9], 12288  }
  0x17   :  { %639 = vsyncadd [#allocation9], 4294955008  ;;  %v107_v0 = vld [vmem:[#allocation5 + $0x10] sm:$0xff]  ;;  %v105_v1 = vld [vmem:[#allocation5] sm:$0xff]  ;;  %vm115_vm0 = vcmask 130048   ;;  %s651_s28 = smov [#allocation11]  }
  0x18   :  { %v108_v2 = vld [vmem:[#allocation5 + $0x18] sm:$0xff]  ;;  %136 = vmatpush.msra.mxu0 %v107_v0  ;;  %v103_v3 = vld [vmem:[#allocation2] sm:$0xff]  ;;  %v106_v4 = vld [vmem:[#allocation5 + $0x8] sm:$0xff]  ;;  %s426_s29 = sshll.u32 %s651_s28, 4  ;;  %s428_s9 = sshll.u32 %s736_s7, 4  ;;  %s427_s29 = int_to_ptr.vmem [resolvable:$true] %s426_s29  ;;  %s429_s9 = int_to_ptr.hbm [resolvable:$true] %s428_s9 }
  0x19   :  { %159 = vmatpush.msra.mxu1 %v108_v2  ;;  %v202_v5 = vld [vmem:[#allocation8 + $0xf0] sm:$0xff]  ;;  %v203_v6 = vld [vmem:[#allocation8 + $0xf8] sm:$0xff]  ;;  %v200_v9 = vld [vmem:[#allocation8 + $0xe0] sm:$0xff] }
  0x1a   :  { %137 = vmatpush.msra.mxu0 %v105_v1  ;;  %v234_v7 = vld [vmem:[#allocation8 + $0x1f0] sm:$0xff]  ;;  %v235_v8 = vld [vmem:[#allocation8 + $0x1f8] sm:$0xff]  ;;  %v201_v10 = vld [vmem:[#allocation8 + $0xe8] sm:$0xff]  ;;  %242 = vmatpush.msra.mxu2 %v202_v5 }
  0x1b   :  { %160 = vmatpush.msra.mxu1 %v106_v4  ;;  %443 = vmatmul.msk.f32.vlgmr.msra.gmra.mxu0 %vm115_vm0, %v103_v3  ;;  %v232_v11 = vld [vmem:[#allocation8 + $0x1e0] sm:$0xff]  ;;  %v233_v12 = vld [vmem:[#allocation8 + $0x1e8] sm:$0xff]  ;;  %v198_v13 = vld [vmem:[#allocation8 + $0xd0] sm:$0xff] }
  0x1c   :  { %445 = vmatmul.msk.f32.vlgmr.msra.gmra.mxu1 %vm115_vm0, %v103_v3  ;;  %288 = vmatpush.msrb.mxu0 %v203_v6  ;;  %v199_v14 = vld [vmem:[#allocation8 + $0xd8] sm:$0xff]  ;;  %v230_v15 = vld [vmem:[#allocation8 + $0x1d0] sm:$0xff]  ;;  %v196_v17 = vld [vmem:[#allocation8 + $0xc0] sm:$0xff] }
  0x1d   :  { %265 = vmatpush.msra.mxu3 %v234_v7  ;;  %311 = vmatpush.msrb.mxu1 %v235_v8  ;;  %v231_v16 = vld [vmem:[#allocation8 + $0x1d8] sm:$0xff]  ;;  %v197_v18 = vld [vmem:[#allocation8 + $0xc8] sm:$0xff]  ;;  %v194_v20 = vld [vmem:[#allocation8 + $0xb0] sm:$0xff] }
  0x1e   :  { %243 = vmatpush.msra.mxu2 %v200_v9  ;;  %289 = vmatpush.msrb.mxu0 %v201_v10  ;;  %v104_v19 = vld [vmem:[#allocation2 + $0x8] sm:$0xff]  ;;  %v228_v21 = vld [vmem:[#allocation8 + $0x1c0] sm:$0xff]  ;;  %v229_v23 = vld [vmem:[#allocation8 + $0x1c8] sm:$0xff] }
  0x1f   :  { %266 = vmatpush.msra.mxu3 %v232_v11  ;;  %312 = vmatpush.msrb.mxu1 %v233_v12  ;;  %v195_v22 = vld [vmem:[#allocation8 + $0xb8] sm:$0xff]  ;;  %v192_v24 = vld [vmem:[#allocation8 + $0xa0] sm:$0xff]  ;;  %v226_v25 = vld [vmem:[#allocation8 + $0x1b0] sm:$0xff] }
  0x20   :  { %244 = vmatpush.msra.mxu2 %v198_v13  ;;  %290 = vmatpush.msrb.mxu0 %v199_v14  ;;  %v193_v26 = vld [vmem:[#allocation8 + $0xa8] sm:$0xff]  ;;  %v227_v27 = vld [vmem:[#allocation8 + $0x1b8] sm:$0xff]  ;;  %v190_v28 = vld [vmem:[#allocation8 + $0x90] sm:$0xff] }
  0x21   :  { %267 = vmatpush.msra.mxu3 %v230_v15  ;;  %313 = vmatpush.msrb.mxu1 %v231_v16  ;;  %v224_v29 = vld [vmem:[#allocation8 + $0x1a0] sm:$0xff]  ;;  %v191_v30 = vld [vmem:[#allocation8 + $0x98] sm:$0xff]  ;;  %v225_v31 = vld [vmem:[#allocation8 + $0x1a8] sm:$0xff] }
  0x22   :  { %245 = vmatpush.msra.mxu2 %v196_v17  ;;  %291 = vmatpush.msrb.mxu0 %v197_v18  ;;  %v188_v32 = vld [vmem:[#allocation8 + $0x80] sm:$0xff]  ;;  %v222_v33 = vld [vmem:[#allocation8 + $0x190] sm:$0xff]  ;;  %v189_v34 = vld [vmem:[#allocation8 + $0x88] sm:$0xff] }
  0x23   :  { %444 = vmatmul.msk.f32.gmra.mxu0 %vm115_vm0, %v104_v19  ;;  %268 = vmatpush.msra.mxu3 %v228_v21  ;;  %v223_v35 = vld [vmem:[#allocation8 + $0x198] sm:$0xff]  ;;  %v186_v36 = vld [vmem:[#allocation8 + $0x70] sm:$0xff]  ;;  %v220_v37 = vld [vmem:[#allocation8 + $0x180] sm:$0xff] }
  0x24   :  { %446 = vmatmul.msk.f32.gmra.mxu1 %vm115_vm0, %v104_v19  ;;  %246 = vmatpush.msra.mxu2 %v194_v20  ;;  %v187_v38 = vld [vmem:[#allocation8 + $0x78] sm:$0xff]  ;;  %v221_v39 = vld [vmem:[#allocation8 + $0x188] sm:$0xff]  ;;  %v184_v40 = vld [vmem:[#allocation8 + $0x60] sm:$0xff] }
  0x25   :  { %292 = vmatpush.msrb.mxu0 %v195_v22  ;;  %314 = vmatpush.msrb.mxu1 %v229_v23  ;;  %v218_v41 = vld [vmem:[#allocation8 + $0x170] sm:$0xff]  ;;  %v185_v42 = vld [vmem:[#allocation8 + $0x68] sm:$0xff]  ;;  %v219_v43 = vld [vmem:[#allocation8 + $0x178] sm:$0xff] }
  0x26   :  { %247 = vmatpush.msra.mxu2 %v192_v24  ;;  %269 = vmatpush.msra.mxu3 %v226_v25  ;;  %v182_v44 = vld [vmem:[#allocation8 + $0x50] sm:$0xff]  ;;  %v216_v45 = vld [vmem:[#allocation8 + $0x160] sm:$0xff]  ;;  %v183_v46 = vld [vmem:[#allocation8 + $0x58] sm:$0xff] }
  0x27   :  { %293 = vmatpush.msrb.mxu0 %v193_v26  ;;  %315 = vmatpush.msrb.mxu1 %v227_v27  ;;  %v217_v47 = vld [vmem:[#allocation8 + $0x168] sm:$0xff]  ;;  %v180_v48 = vld [vmem:[#allocation8 + $0x40] sm:$0xff]  ;;  %v214_v49 = vld [vmem:[#allocation8 + $0x150] sm:$0xff] }
  0x28   :  { %248 = vmatpush.msra.mxu2 %v190_v28  ;;  %270 = vmatpush.msra.mxu3 %v224_v29  ;;  %v181_v50 = vld [vmem:[#allocation8 + $0x48] sm:$0xff]  ;;  %v215_v51 = vld [vmem:[#allocation8 + $0x158] sm:$0xff]  ;;  %v178_v52 = vld [vmem:[#allocation8 + $0x30] sm:$0xff] }
  0x29   :  { %294 = vmatpush.msrb.mxu0 %v191_v30  ;;  %316 = vmatpush.msrb.mxu1 %v225_v31  ;;  %v212_v53 = vld [vmem:[#allocation8 + $0x140] sm:$0xff]  ;;  %v179_v54 = vld [vmem:[#allocation8 + $0x38] sm:$0xff]  ;;  %v213_v55 = vld [vmem:[#allocation8 + $0x148] sm:$0xff] }
  0x2a   :  { %249 = vmatpush.msra.mxu2 %v188_v32  ;;  %271 = vmatpush.msra.mxu3 %v222_v33  ;;  %v176_v56 = vld [vmem:[#allocation8 + $0x20] sm:$0xff]  ;;  %v210_v57 = vld [vmem:[#allocation8 + $0x130] sm:$0xff]  ;;  %v177_v58 = vld [vmem:[#allocation8 + $0x28] sm:$0xff] }
  0x2b   :  { %295 = vmatpush.msrb.mxu0 %v189_v34  ;;  %317 = vmatpush.msrb.mxu1 %v223_v35  ;;  %v211_v59 = vld [vmem:[#allocation8 + $0x138] sm:$0xff]  ;;  %v174_v60 = vld [vmem:[#allocation8 + $0x10] sm:$0xff]  ;;  %v208_v61 = vld [vmem:[#allocation8 + $0x120] sm:$0xff] }
  0x2c   :  { %250 = vmatpush.msra.mxu2 %v186_v36  ;;  %272 = vmatpush.msra.mxu3 %v220_v37  ;;  %v175_v62 = vld [vmem:[#allocation8 + $0x18] sm:$0xff]  ;;  %v209_v63 = vld [vmem:[#allocation8 + $0x128] sm:$0xff]  ;;  %v172_v0 = vld [vmem:[#allocation8] sm:$0xff] }
  0x2d   :  { %296 = vmatpush.msrb.mxu0 %v187_v38  ;;  %318 = vmatpush.msrb.mxu1 %v221_v39  ;;  %v206_v1 = vld [vmem:[#allocation8 + $0x110] sm:$0xff]  ;;  %v173_v2 = vld [vmem:[#allocation8 + $0x8] sm:$0xff]  ;;  %v207_v3 = vld [vmem:[#allocation8 + $0x118] sm:$0xff] }
  0x2e   :  { %251 = vmatpush.msra.mxu2 %v184_v40  ;;  %273 = vmatpush.msra.mxu3 %v218_v41  ;;  %v204_v4 = vld [vmem:[#allocation8 + $0x100] sm:$0xff]  ;;  %v205_v5 = vld [vmem:[#allocation8 + $0x108] sm:$0xff]  ;;  %v369_v6 = vld [vmem:[#allocation10 + $0xf8] sm:$0xff] }
  0x2f   :  { %297 = vmatpush.msrb.mxu0 %v185_v42  ;;  %319 = vmatpush.msrb.mxu1 %v219_v43  ;;  %v368_v7 = vld [vmem:[#allocation10 + $0xf0] sm:$0xff]  ;;  %v353_v8 = vld [vmem:[#allocation10 + $0x78] sm:$0xff]  ;;  %v367_v10 = vld [vmem:[#allocation10 + $0xe8] sm:$0xff] }
  0x30   :  { %252 = vmatpush.msra.mxu2 %v182_v44  ;;  %274 = vmatpush.msra.mxu3 %v216_v45  ;;  %v352_v9 = vld [vmem:[#allocation10 + $0x70] sm:$0xff]  ;;  %v351_v11 = vld [vmem:[#allocation10 + $0x68] sm:$0xff]  ;;  %v366_v12 = vld [vmem:[#allocation10 + $0xe0] sm:$0xff] }
  0x31   :  { %298 = vmatpush.msrb.mxu0 %v183_v46  ;;  %320 = vmatpush.msrb.mxu1 %v217_v47  ;;  %v350_v13 = vld [vmem:[#allocation10 + $0x60] sm:$0xff]  ;;  %v365_v14 = vld [vmem:[#allocation10 + $0xd8] sm:$0xff]  ;;  %v364_v16 = vld [vmem:[#allocation10 + $0xd0] sm:$0xff] }
  0x32   :  { %253 = vmatpush.msra.mxu2 %v180_v48  ;;  %275 = vmatpush.msra.mxu3 %v214_v49  ;;  %v349_v15 = vld [vmem:[#allocation10 + $0x58] sm:$0xff]  ;;  %v348_v17 = vld [vmem:[#allocation10 + $0x50] sm:$0xff]  ;;  %v363_v18 = vld [vmem:[#allocation10 + $0xc8] sm:$0xff] }
  0x33   :  { %299 = vmatpush.msrb.mxu0 %v181_v50  ;;  %321 = vmatpush.msrb.mxu1 %v215_v51  ;;  %v347_v19 = vld [vmem:[#allocation10 + $0x48] sm:$0xff]  ;;  %v109_v20 = vld [vmem:[#allocation7] sm:$0x3]  ;;  %v362_v21 = vld [vmem:[#allocation10 + $0xc0] sm:$0xff] }
  0x34   :  { %254 = vmatpush.msra.mxu2 %v178_v52  ;;  %276 = vmatpush.msra.mxu3 %v212_v53  ;;  %v346_v22 = vld [vmem:[#allocation10 + $0x40] sm:$0xff]  ;;  %v361_v23 = vld [vmem:[#allocation10 + $0xb8] sm:$0xff]  ;;  %v111_v24 = vperm.slane %v109_v20, 0  ;;  %v112_v25 = vperm.slane %v109_v20, 1  ;;  %v360_v27 = vld [vmem:[#allocation10 + $0xb0] sm:$0xff] }
  0x35   :  { %300 = vmatpush.msrb.mxu0 %v179_v54  ;;  %322 = vmatpush.msrb.mxu1 %v213_v55  ;;  %v345_v26 = vld [vmem:[#allocation10 + $0x38] sm:$0xff]  ;;  %v359_v30 = vld [vmem:[#allocation10 + $0xa8] sm:$0xff]  ;;  %v358_v35 = vld [vmem:[#allocation10 + $0xa0] sm:$0xff] }
  0x36   :  { %255 = vmatpush.msra.mxu2 %v176_v56  ;;  %277 = vmatpush.msra.mxu3 %v210_v57  ;;  %v344_v42 = vld [vmem:[#allocation10 + $0x30] sm:$0xff]  ;;  %v357_v43 = vld [vmem:[#allocation10 + $0x98] sm:$0xff]  ;;  %v343_v44 = vld [vmem:[#allocation10 + $0x28] sm:$0xff] }
  0x37   :  { %301 = vmatpush.msrb.mxu0 %v177_v58  ;;  %323 = vmatpush.msrb.mxu1 %v211_v59  ;;  %v356_v45 = vld [vmem:[#allocation10 + $0x90] sm:$0xff]  ;;  %v342_v46 = vld [vmem:[#allocation10 + $0x20] sm:$0xff]  ;;  %v355_v47 = vld [vmem:[#allocation10 + $0x88] sm:$0xff] }
  0x38   :  { %256 = vmatpush.msra.mxu2 %v174_v60  ;;  %278 = vmatpush.msra.mxu3 %v208_v61  ;;  %v341_v48 = vld [vmem:[#allocation10 + $0x18] sm:$0xff]  ;;  %v354_v49 = vld [vmem:[#allocation10 + $0x80] sm:$0xff]  ;;  %v340_v50 = vld [vmem:[#allocation10 + $0x10] sm:$0xff] }
  0x39   :  { %302 = vmatpush.msrb.mxu0 %v175_v62  ;;  %324 = vmatpush.msrb.mxu1 %v209_v63  ;;  %v339_v51 = vld [vmem:[#allocation10 + $0x8] sm:$0xff]  ;;  %v338_v52 = vld [vmem:[#allocation10] sm:$0xff] }
  0x3a   :  { %257 = vmatpush.msra.mxu2 %v172_v0  ;;  %279 = vmatpush.msra.mxu3 %v206_v1  ;;  %v236_v53 = vld [vmem:[%s733_s4] sm:$0x3] }
  0x3b   :  { %303 = vmatpush.msrb.mxu0 %v173_v2  ;;  %325 = vmatpush.msrb.mxu1 %v207_v3  ;;  %v239_v54 = vperm.slane %v236_v53, 1  ;;  %v238_v59 = vperm.slane %v236_v53, 0 }
  0x3c   :  { %280 = vmatpush.msra.mxu3 %v204_v4  ;;  %447 = vmatpush.msrb.mxu2 %v353_v8 }
  0x3d   :  { %326 = vmatpush.msrb.mxu1 %v205_v5  ;;  %374 = vmatpush.msra.mxu0 %v353_v8 }
  0x3e   :  { %463 = vmatpush.msrb.mxu3 %v369_v6  ;;  %448 = vmatpush.msrb.mxu2 %v352_v9 }
  0x3f   :  { %397 = vmatpush.msra.mxu1 %v369_v6  ;;  %375 = vmatpush.msra.mxu0 %v352_v9 }
  0x40   :  { %464 = vmatpush.msrb.mxu3 %v368_v7  ;;  %449 = vmatpush.msrb.mxu2 %v351_v11 }
  0x41   :  { %398 = vmatpush.msra.mxu1 %v368_v7  ;;  %376 = vmatpush.msra.mxu0 %v351_v11 }
  0x42   :  { %465 = vmatpush.msrb.mxu3 %v367_v10  ;;  %450 = vmatpush.msrb.mxu2 %v350_v13 }
  0x43   :  { %399 = vmatpush.msra.mxu1 %v367_v10  ;;  %377 = vmatpush.msra.mxu0 %v350_v13 }
  0x44   :  { %466 = vmatpush.msrb.mxu3 %v366_v12  ;;  %451 = vmatpush.msrb.mxu2 %v349_v15 }
  0x45   :  { %400 = vmatpush.msra.mxu1 %v366_v12  ;;  %378 = vmatpush.msra.mxu0 %v349_v15  ;;  %v489_v12 = vld [vmem:[%s735_s6] ss:$0 sm:$0xff] }
  0x46   :  { %467 = vmatpush.msrb.mxu3 %v365_v14  ;;  %452 = vmatpush.msrb.mxu2 %v348_v17 }
  0x47   :  { %401 = vmatpush.msra.mxu1 %v365_v14  ;;  %379 = vmatpush.msra.mxu0 %v348_v17 }
  0x48   :  { %468 = vmatpush.msrb.mxu3 %v364_v16  ;;  %453 = vmatpush.msrb.mxu2 %v347_v19 }
  0x49   :  { %402 = vmatpush.msra.mxu1 %v364_v16  ;;  %380 = vmatpush.msra.mxu0 %v347_v19 }
  0x4a   :  { %469 = vmatpush.msrb.mxu3 %v363_v18  ;;  %454 = vmatpush.msrb.mxu2 %v346_v22 }
  0x4b   :  { %403 = vmatpush.msra.mxu1 %v363_v18  ;;  %381 = vmatpush.msra.mxu0 %v346_v22 }
  0x4c   :  { %470 = vmatpush.msrb.mxu3 %v362_v21  ;;  %455 = vmatpush.msrb.mxu2 %v345_v26 }
  0x4d   :  { %404 = vmatpush.msra.mxu1 %v362_v21  ;;  %382 = vmatpush.msra.mxu0 %v345_v26 }
  0x4e   :  { %471 = vmatpush.msrb.mxu3 %v361_v23  ;;  %456 = vmatpush.msrb.mxu2 %v344_v42 }
  0x4f   :  { %405 = vmatpush.msra.mxu1 %v361_v23  ;;  %383 = vmatpush.msra.mxu0 %v344_v42 }
  0x50   :  { %472 = vmatpush.msrb.mxu3 %v360_v27  ;;  %457 = vmatpush.msrb.mxu2 %v343_v44 }
  0x51   :  { %406 = vmatpush.msra.mxu1 %v360_v27  ;;  %384 = vmatpush.msra.mxu0 %v343_v44 }
  0x52   :  { %473 = vmatpush.msrb.mxu3 %v359_v30  ;;  %458 = vmatpush.msrb.mxu2 %v342_v46 }
  0x53   :  { %407 = vmatpush.msra.mxu1 %v359_v30  ;;  %385 = vmatpush.msra.mxu0 %v342_v46 }
  0x54   :  { %474 = vmatpush.msrb.mxu3 %v358_v35  ;;  %459 = vmatpush.msrb.mxu2 %v341_v48 }
  0x55   :  { %408 = vmatpush.msra.mxu1 %v358_v35  ;;  %386 = vmatpush.msra.mxu0 %v341_v48 }
  0x56   :  { %475 = vmatpush.msrb.mxu3 %v357_v43  ;;  %460 = vmatpush.msrb.mxu2 %v340_v50 }
  0x57   :  { %409 = vmatpush.msra.mxu1 %v357_v43  ;;  %387 = vmatpush.msra.mxu0 %v340_v50 }
  0x58   :  { %476 = vmatpush.msrb.mxu3 %v356_v45  ;;  %461 = vmatpush.msrb.mxu2 %v339_v51 }
  0x59   :  { %410 = vmatpush.msra.mxu1 %v356_v45  ;;  %388 = vmatpush.msra.mxu0 %v339_v51 }
  0x5a   :  { %477 = vmatpush.msrb.mxu3 %v355_v47  ;;  %462 = vmatpush.msrb.mxu2 %v338_v52 }
  0x5b   :  { %411 = vmatpush.msra.mxu1 %v355_v47  ;;  %389 = vmatpush.msra.mxu0 %v338_v52 }
  0x5c   :  { %478 = vmatpush.msrb.mxu3 %v354_v49 }
  0x5d   :  { %412 = vmatpush.msra.mxu1 %v354_v49 }
  0x98   :  { %v139_v28 = vpop.f32.mrf.mxu0 }
  0x99   :  { %v162_v29 = vpop.f32.mrf.mxu1  ;;  %v140_v31 = vadd.f32 %v139_v28, %v111_v24 }
  0x9a   :  { %v163_v32 = vadd.f32 %v162_v29, %v112_v25 }
  0x9b   :  { %v168_v33 = vmax.f32 %v140_v31, 0.0 }
  0x9c   :  { %v169_v34 = vmax.f32 %v163_v32, 0.0 }
  0x9d   :  { %258 = vmatmul.f32.vlgmr.msra.gmra.mxu2 %v168_v33  ;;  %304 = vmatmul.f32.vlgmr.msrb.gmra.mxu0 %v168_v33 }
  0x9e   :  { %281 = vmatmul.f32.vlgmr.msra.gmra.mxu3 %v169_v34  ;;  %327 = vmatmul.f32.vlgmr.msrb.gmra.mxu1 %v169_v34 }
  0xa0   :  { %v142_v36 = vpop.f32.mrf.mxu0 }
  0xa1   :  { %v165_v37 = vpop.f32.mrf.mxu1  ;;  %v143_v38 = vadd.f32 %v142_v36, %v111_v24 }
  0xa2   :  { %v166_v39 = vadd.f32 %v165_v37, %v112_v25 }
  0xa3   :  { %v170_v40 = vmax.f32 %v143_v38, 0.0 }
  0xa4   :  { %v171_v41 = vmax.f32 %v166_v39, 0.0 }
  0xa5   :  { %261 = vmatmul.f32.gmra.mxu2 %v170_v40  ;;  %307 = vmatmul.f32.gmra.mxu0 %v170_v40 }
  0xa6   :  { %284 = vmatmul.f32.gmra.mxu3 %v171_v41  ;;  %330 = vmatmul.f32.gmra.mxu1 %v171_v41 }
 0x11a   :  { %v305_v55 = vpop.f32.mrf.mxu0 }
 0x11b   :  { %v306_v56 = vadd.f32 %v305_v55, %v239_v54  ;;  %v328_v57 = vpop.f32.mrf.mxu1 }
 0x11d   :  { %v329_v58 = vadd.f32 %v328_v57, %v306_v56 }
 0x11f   :  { %v335_v60 = vmax.f32 %v329_v58, 0.0 }
 0x120   :  { %v259_v61 = vpop.f32.mrf.mxu2 }
 0x121   :  { %v260_v62 = vadd.f32 %v259_v61, %v238_v59  ;;  %413 = vmatmul.f32.vlgmr.msra.gmra.mxu1 %v335_v60  ;;  %v282_v63 = vpop.f32.mrf.mxu3 }
 0x122   :  { %v308_v0 = vpop.f32.mrf.mxu0 }
 0x123   :  { %v283_v1 = vadd.f32 %v282_v63, %v260_v62  ;;  %v309_v2 = vadd.f32 %v308_v0, %v239_v54  ;;  %v331_v3 = vpop.f32.mrf.mxu1 }
 0x125   :  { %v334_v4 = vmax.f32 %v283_v1, 0.0  ;;  %v332_v5 = vadd.f32 %v331_v3, %v309_v2 }
 0x127   :  { %v337_v6 = vmax.f32 %v332_v5, 0.0  ;;  %390 = vmatmul.f32.vlgmr.msra.gmra.mxu0 %v334_v4 }
 0x128   :  { %v262_v7 = vpop.f32.mrf.mxu2 }
 0x129   :  { %v263_v8 = vadd.f32 %v262_v7, %v238_v59  ;;  %416 = vmatmul.f32.vlgmr.msrb.gmra.mxu3 %v337_v6  ;;  %v285_v9 = vpop.f32.mrf.mxu3 }
 0x12b   :  { %v286_v10 = vadd.f32 %v285_v9, %v263_v8 }
 0x12d   :  { %v336_v11 = vmax.f32 %v286_v10, 0.0 }
 0x12f   :  { %393 = vmatmul.f32.vlgmr.msrb.gmra.mxu2 %v336_v11 }
 0x19e   :  { %v414_v15 = vpop.f32.mrf.mxu1 }
 0x1a4   :  { %v391_v13 = vpop.f32.mrf.mxu0 }
 0x1a5   :  { %v392_v14 = vadd.f32 %v489_v12, %v391_v13 }
 0x1a7   :  { %v415_v16 = vadd.f32 %v414_v15, %v392_v14 }
 0x1a9   :  { %420 = vst [vmem:[#allocation11] sm:$0xff] %v415_v16 }
 0x1ac   :  { %v417_v19 = vpop.f32.mrf.mxu3 }
 0x1b2   :  { %v394_v17 = vpop.f32.mrf.mxu2 }
 0x1b3   :  { %v395_v18 = vadd.f32 %v489_v12, %v394_v17 }
 0x1b5   :  { %v418_v20 = vadd.f32 %v417_v19, %v395_v18 }
 0x1b7   :  { %421 = vst [vmem:[#allocation11 + $0x8] sm:$0xff] %v418_v20 }
 0x1b8   :  { %434 = dma.vmem_to_hbm [thread:$0]  %s427_s29, 256, %s429_s9, [#allocation4], %s647_s19, %s647_s19, %s648_s20  }
 0x1b9   :  { %640 = dma.done.wait [#allocation4], 256  }
 0x1ba   :  { %641 = vsyncadd [#allocation4], 4294967040 }
 0x1bb   :  { %439 = vsyncpa [#allocation3], 1 }
 0x1bc   :  { %440 = vsyncpa [#allocation6], 1 }
 0x1bd   :  { %441 = vsyncpa [#allocation9], 1 }
 0x1be   :  { %442 = vsyncpa [#allocation4], 1 }

</bundles_post_ra>
